<compile_context>
chip_gen: v7x
topology: tpu7x:2x2x1
jax: 0.10.0
libtpu: 0.0.40
codegen_flags: <defaults>
</compile_context>

<pallas_src>
import functools

import jax
import jax.numpy as jnp
from jax.experimental import pallas as pl
from jax.experimental.pallas import tpu as pltpu

_K = 4        # contraction dim fixed by the module (all weights are 4 x N)
_N_PAD = 128  # lane width -> unmasked, lane-dense stores
_M_MIN = 8    # sublane height
_TILE_M = 512 # M-tile for the gridded (large-M) path


def _dict_dense_kernel(x_ref, w_ref, o_ref):
    """o = x @ W on padded tiles.

    x_ref : VMEM f32[tm, 4]     -- zero-padded input rows
    w_ref : VMEM f32[4, 128]    -- one weight, zero-padded to 128 lanes
    o_ref : VMEM f32[tm, 128]   -- lane-dense output slab
    """
    x = x_ref[...]
    w = w_ref[...]
    # Unrolled K=4 multiply-add on the VPU (below one bundle's VALU budget;
    # avoids MXU systolic fill/drain for a contraction this tiny).
    acc = x[:, 0:1] * w[0:1, :]
    for k in range(1, _K):
        acc = acc + x[:, k:k + 1] * w[k:k + 1, :]
    o_ref[...] = acc


@functools.partial(jax.jit, static_argnames=("n_out",))
def _dict_dense_forward(x, w_slab, *, n_out):
    """Fused pad -> kernel -> slice.  One device dispatch per call."""
    m, k = x.shape
    assert k == _K, f"expected inner dim {_K}, got {k}"
    x = x.astype(jnp.float32)

    if m <= _TILE_M:
        # Small-M path: grid-free, whole problem resident in VMEM.
        m_pad = max(_M_MIN, ((m + _M_MIN - 1) // _M_MIN) * _M_MIN)
        x_pad = jnp.pad(x, ((0, m_pad - m), (0, 0)))
        cost = pl.CostEstimate(
            flops=2 * m_pad * _K * _N_PAD,
            transcendentals=0,
            bytes_accessed=4 * (x_pad.size + w_slab.size + m_pad * _N_PAD),
        )
        out_pad = pl.pallas_call(
            _dict_dense_kernel,
            out_shape=jax.ShapeDtypeStruct((m_pad, _N_PAD), jnp.float32),
            in_specs=[
                pl.BlockSpec(memory_space=pltpu.MemorySpace.VMEM),  # x_pad
                pl.BlockSpec(memory_space=pltpu.MemorySpace.VMEM),  # weight slab
            ],
            out_specs=pl.BlockSpec(memory_space=pltpu.MemorySpace.VMEM),
            cost_estimate=cost,
        )(x_pad, w_slab)
    else:
        # Large-M path: 1-D grid over M, 512-row tiles, weights unblocked.
        m_pad = ((m + _TILE_M - 1) // _TILE_M) * _TILE_M
        x_pad = jnp.pad(x, ((0, m_pad - m), (0, 0)))
        cost = pl.CostEstimate(
            flops=2 * m_pad * _K * _N_PAD,
            transcendentals=0,
            bytes_accessed=4 * (x_pad.size + w_slab.size + m_pad * _N_PAD),
        )
        out_pad = pl.pallas_call(
            _dict_dense_kernel,
            out_shape=jax.ShapeDtypeStruct((m_pad, _N_PAD), jnp.float32),
            grid=(m_pad // _TILE_M,),
            in_specs=[
                pl.BlockSpec((_TILE_M, _K), lambda i: (i, 0)),
                pl.BlockSpec((_K, _N_PAD), lambda i: (0, 0)),
            ],
            out_specs=pl.BlockSpec((_TILE_M, _N_PAD), lambda i: (i, 0)),
            compiler_params=pltpu.CompilerParams(
                dimension_semantics=("parallel",)),  # megacore split on v7x
            cost_estimate=cost,
        )(x_pad, w_slab)

    return out_pad[:m, :n_out]


class MyDictDensePallas:
    """JAX/Pallas port of the PyTorch MyDictDense module."""

    _CHOICES = ("Linear1", "Linear2", "Linear3")

    def __init__(self, key: jax.Array):
        k1, k2, k3 = jax.random.split(key, 3)
        # Deterministic stand-in for torch.randn parameter init.
        self.params = {
            "Linear1": jax.random.normal(k1, (4, 4), dtype=jnp.float32),
            "Linear2": jax.random.normal(k2, (4, 1), dtype=jnp.float32),
            "Linear3": jax.random.normal(k3, (4, 2), dtype=jnp.float32),
        }
        # Cache per-choice device-resident lane-dense (4, 128) weight slabs once.
        self._w_slab = {
            name: jnp.pad(w, ((0, 0), (0, _N_PAD - w.shape[1])))
            for name, w in self.params.items()
        }

    def __call__(self, x: jax.Array, choice: str = "Linear1") -> jax.Array:
        w_slab = self._w_slab[choice]                 # cached, no H2D per call
        n_out = self.params[choice].shape[1]          # static -> fused slice
        return _dict_dense_forward(x, w_slab, n_out=n_out)


if __name__ == "__main__":
    key = jax.random.PRNGKey(0)
    k_params, k_input = jax.random.split(key)

    model = MyDictDensePallas(k_params)

    # torch.mm(input, W[4, *]) requires input of shape [batch, 4]; use batch=2.
    x = jax.random.normal(k_input, (2, 4), dtype=jnp.float32)

    for choice in ("Linear1", "Linear2", "Linear3"):
        out = jax.block_until_ready(model(x, choice=choice))
        ref = x @ model.params[choice]
        assert out.shape == ref.shape, (out.shape, ref.shape)
        assert jnp.allclose(out, ref, atol=1e-5, rtol=1e-5), choice

    print("KERNEL_OK")
</pallas_src>

<mosaic_0001>
module attributes {stable_mosaic.version = 11 : i64} {
  func.func @_dict_dense_kernel(%arg0: memref<8x4xf32, #tpu.memory_space<vmem>>, %arg1: memref<4x128xf32, #tpu.memory_space<vmem>>, %arg2: memref<8x128xf32, #tpu.memory_space<vmem>>) attributes {dimension_semantics = [], scalar_prefetch = 0 : i64, scratch_operands = 0 : i64, tpu.core_type = #tpu.core_type<tc>} {
    %c0 = arith.constant 0 : index
    %c0_0 = arith.constant 0 : index
    %0 = vector.load %arg0[%c0, %c0_0] : memref<8x4xf32, #tpu.memory_space<vmem>>, vector<8x4xf32>
    %c0_1 = arith.constant 0 : index
    %c0_2 = arith.constant 0 : index
    %1 = vector.load %arg1[%c0_1, %c0_2] : memref<4x128xf32, #tpu.memory_space<vmem>>, vector<4x128xf32>
    %2 = vector.extract_strided_slice %0 {offsets = [0, 0], sizes = [8, 1], strides = [1, 1]} : vector<8x4xf32> to vector<8x1xf32>
    %3 = vector.extract_strided_slice %1 {offsets = [0, 0], sizes = [1, 128], strides = [1, 1]} : vector<4x128xf32> to vector<1x128xf32>
    %4 = vector.broadcast %2 : vector<8x1xf32> to vector<8x128xf32>
    %5 = vector.broadcast %3 : vector<1x128xf32> to vector<8x128xf32>
    %6 = arith.mulf %4, %5 : vector<8x128xf32>
    %7 = vector.extract_strided_slice %0 {offsets = [0, 1], sizes = [8, 1], strides = [1, 1]} : vector<8x4xf32> to vector<8x1xf32>
    %8 = vector.extract_strided_slice %1 {offsets = [1, 0], sizes = [1, 128], strides = [1, 1]} : vector<4x128xf32> to vector<1x128xf32>
    %9 = vector.broadcast %7 : vector<8x1xf32> to vector<8x128xf32>
    %10 = vector.broadcast %8 : vector<1x128xf32> to vector<8x128xf32>
    %11 = arith.mulf %9, %10 : vector<8x128xf32>
    %12 = arith.addf %6, %11 : vector<8x128xf32>
    %13 = vector.extract_strided_slice %0 {offsets = [0, 2], sizes = [8, 1], strides = [1, 1]} : vector<8x4xf32> to vector<8x1xf32>
    %14 = vector.extract_strided_slice %1 {offsets = [2, 0], sizes = [1, 128], strides = [1, 1]} : vector<4x128xf32> to vector<1x128xf32>
    %15 = vector.broadcast %13 : vector<8x1xf32> to vector<8x128xf32>
    %16 = vector.broadcast %14 : vector<1x128xf32> to vector<8x128xf32>
    %17 = arith.mulf %15, %16 : vector<8x128xf32>
    %18 = arith.addf %12, %17 : vector<8x128xf32>
    %19 = vector.extract_strided_slice %0 {offsets = [0, 3], sizes = [8, 1], strides = [1, 1]} : vector<8x4xf32> to vector<8x1xf32>
    %20 = vector.extract_strided_slice %1 {offsets = [3, 0], sizes = [1, 128], strides = [1, 1]} : vector<4x128xf32> to vector<1x128xf32>
    %21 = vector.broadcast %19 : vector<8x1xf32> to vector<8x128xf32>
    %22 = vector.broadcast %20 : vector<1x128xf32> to vector<8x128xf32>
    %23 = arith.mulf %21, %22 : vector<8x128xf32>
    %24 = arith.addf %18, %23 : vector<8x128xf32>
    %c0_3 = arith.constant 0 : index
    %c0_4 = arith.constant 0 : index
    %25 = vector.load %arg2[%c0_3, %c0_4] : memref<8x128xf32, #tpu.memory_space<vmem>>, vector<8x128xf32>
    tpu.vector_store %arg2[%c0_3, %c0_4], %24 {strides = array<i32>} : memref<8x128xf32, #tpu.memory_space<vmem>>, vector<8x128xf32>,
    return
  }
}

</mosaic_0001>

<bundles_post_ra>
// kernel: _dict_dense_forward.1
= control target key start
LH: loop header
LB: loop body
LE: loop exit
PB: predicated region body
PF: predicated region fallthrough
CT: control target
= control target key end

     0   :  { %v67_v0 = vmov 0   ;;  %v68_v2 = vmov 2   ;;  %v69_v3 = vmov 1   ;;  %v70_v4 = vmov 3   ;;  %s95_s0 = inlined_call_operand.vmem [shape: f32[8,4], index: 0, kind: input, shape index: {}]   ;;  %s96_s1 = inlined_call_operand.vmem [shape: f32[4,128], index: 1, kind: input, shape index: {}]   ;;  %s97_s2 = inlined_call_operand.vmem [shape: f32[8,128], index: 2, kind: output, shape index: {}]  }
   0x1   :  { %62 = vset.pattern.permute.xlu0 %v67_v0  ;;  %v11_v1 = vld [vmem:[%s95_s0] sm:$0xff]  ;;  %64 = vset.pattern.permute.xlu1 %v68_v2  ;;  %v18_v5 = vlaneseq }
   0x2   :  { %15 = vperm.xlu0 %62, %v11_v1   ;;  %34 = vperm.xlu1 %64, %v11_v1   ;;  %v12_v9 = vld [vmem:[%s96_s1] sm:$0xf] }
   0x3   :  { %v19_v6 = vshrl.u32 %v18_v5, 7 }
   0x5   :  { %v20_v7 = vsub.s32 0, %v19_v6  ;;  %v29_v8 = vsub.s32 1, %v19_v6  ;;  %v39_v11 = vsub.s32 2, %v19_v6  ;;  %v49_v13 = vsub.s32 3, %v19_v6 }
   0x6   :  { %63 = vset.pattern.permute.xlu0 %v69_v3  ;;  %65 = vset.pattern.permute.xlu1 %v70_v4 }
   0x7   :  { %24 = vperm.xlu0 %63, %v11_v1   ;;  %44 = vperm.xlu1 %65, %v11_v1   ;;  %v21_v14 = vrot.slane %v12_v9, %v20_v7  ;;  %v30_v15 = vrot.slane %v12_v9, %v29_v8  ;;  %v40_v16 = vrot.slane %v12_v9, %v39_v11 }
   0x8   :  { %v50_v17 = vrot.slane %v12_v9, %v49_v13 }
   0xb   :  { %66 = vset.pattern.permute.xlu0 %v70_v4 }
  0x81   :  { %v16_v10 = vpop.permute.xlu0 %15  ;;  %v35_v12 = vpop.permute.xlu1 %34 }
  0x82   :  { %v22_v20 = vmul.f32 %v21_v14, %v16_v10  ;;  %v41_v22 = vmul.f32 %v40_v16, %v35_v12 }
  0x86   :  { %v25_v18 = vpop.permute.xlu0 %24  ;;  %v45_v19 = vpop.permute.xlu1 %44 }
  0x87   :  { %v31_v21 = vmul.f32 %v30_v15, %v25_v18  ;;  %v51_v24 = vmul.f32 %v50_v17, %v45_v19 }
  0x89   :  { %v32_v23 = vadd.f32 %v31_v21, %v22_v20 }
  0x8b   :  { %v42_v25 = vadd.f32 %v41_v22, %v32_v23 }
  0x8d   :  { %v52_v26 = vadd.f32 %v51_v24, %v42_v25 }
  0x8f   :  { %53 = vst [vmem:[%s97_s2] sm:$0xff] %v52_v26 }

</bundles_post_ra>
